<compile_context>
chip_gen: v7x
topology: tpu7x:2x2x1
jax: 0.10.0
libtpu: 0.0.40
codegen_flags: <defaults>
</compile_context>

<pallas_src>
import math
import functools

import jax
import jax.numpy as jnp
from jax.experimental import pallas as pl
from jax.experimental.pallas import tpu as pltpu


def _round_up(x, m):
    return ((x + m - 1) // m) * m


def _proj_kernel(x_ref, w_ref, b_ref, o_ref, *, compute_dtype):
    x = x_ref[...]
    w = w_ref[...]
    if compute_dtype is not None:
        # Per-tile cast in VMEM (VPU); no extra HBM pass over x or W.
        x = x.astype(compute_dtype)
        w = w.astype(compute_dtype)
    acc = jnp.dot(x, w, preferred_element_type=jnp.float32)
    o_ref[...] = (acc + b_ref[...].astype(jnp.float32)).astype(o_ref.dtype)


def _vmem_capacity_bytes():
    # Trace-time hardware query; conservative (v7x-sized) fallback if the
    # query is unavailable.
    try:
        return int(pltpu.get_tpu_info().vmem_capacity_bytes)
    except Exception:
        return 64 << 20


@functools.partial(
    jax.jit, static_argnames=("tm", "tn", "compute_dtype", "out_dtype")
)
def projection_layer(x, w, b, *, tm=512, tn=512, compute_dtype=None,
                     out_dtype=None):
    """x: [B, T, D], w: [D, V], b: [V] -> [B, T, V]  (== x @ w + b).

    For best performance store `w` (and ideally `x`) persistently in bf16 and
    pass compute_dtype=jnp.bfloat16; accumulation stays in f32.  On v5e/v6e
    (128 MiB VMEM) larger tm (e.g. 1024) is admitted by the generation-aware
    VMEM budget and raises arithmetic intensity further.
    """
    B, T, D = x.shape
    V = w.shape[1]
    M = B * T

    out_dtype = jnp.dtype(out_dtype) if out_dtype is not None else x.dtype

    x2 = x.reshape(M, D)          # no dtype cast here (see header comment)
    b2 = b.reshape(1, V)

    x_size = x2.dtype.itemsize
    w_size = w.dtype.itemsize
    b_size = b2.dtype.itemsize
    out_size = jnp.dtype(out_dtype).itemsize

    # ---- tile sizing -------------------------------------------------------
    # Clamp requested tiles to the (padded) problem size; keep (8, 128)
    # alignment so masked remainder tiles stay legal.
    tm_eff = min(_round_up(tm, 8), _round_up(M, 8))
    tn_eff = min(_round_up(tn, 128), _round_up(V, 128))

    def _tile_bytes(tm_, tn_):
        # Double-buffered working set for x, w, bias and the output tile.
        return 2 * (tm_ * D * x_size + D * tn_ * w_size
                    + tn_ * b_size + tm_ * tn_ * out_size)

    vmem_cap = _vmem_capacity_bytes()
    budget = min(int(0.70 * vmem_cap), vmem_cap - (16 << 20))

    # Shrink tn first (multiples of 256, floor 256), then tm (floor 256).
    while _tile_bytes(tm_eff, tn_eff) > budget and tn_eff > 256:
        tn_eff = max(256, ((tn_eff // 2) // 256) * 256)
    while _tile_bytes(tm_eff, tn_eff) > budget and tm_eff > 256:
        tm_eff = max(256, ((tm_eff // 2) // 256) * 256)
    # Safety net for huge D / tiny VMEM: allow sub-256 tiles, keep alignment.
    while _tile_bytes(tm_eff, tn_eff) > budget and tn_eff > 128:
        tn_eff = max(128, ((tn_eff // 2) // 128) * 128)
    while _tile_bytes(tm_eff, tn_eff) > budget and tm_eff > 8:
        tm_eff = max(8, ((tm_eff // 2) // 8) * 8)

    grid_m = pl.cdiv(M, tm_eff)
    grid_n = pl.cdiv(V, tn_eff)

    # ---- loop order: re-stream the smaller operand -------------------------
    # m-outer: x read once, W streamed grid_m times.
    # n-outer: W read once, x streamed grid_n times.
    bytes_m_outer = M * D * x_size + grid_m * D * V * w_size
    bytes_n_outer = grid_n * M * D * x_size + D * V * w_size
    n_outer = bytes_n_outer < bytes_m_outer

    if n_outer:
        grid = (grid_n, grid_m)
        x_spec = pl.BlockSpec((tm_eff, D), lambda n, m: (m, 0))
        w_spec = pl.BlockSpec((D, tn_eff), lambda n, m: (0, n))
        b_spec = pl.BlockSpec((1, tn_eff), lambda n, m: (0, n))
        o_spec = pl.BlockSpec((tm_eff, tn_eff), lambda n, m: (m, n))
    else:
        grid = (grid_m, grid_n)
        x_spec = pl.BlockSpec((tm_eff, D), lambda m, n: (m, 0))
        w_spec = pl.BlockSpec((D, tn_eff), lambda m, n: (0, n))
        b_spec = pl.BlockSpec((1, tn_eff), lambda m, n: (0, n))
        o_spec = pl.BlockSpec((tm_eff, tn_eff), lambda m, n: (m, n))

    # ---- VMEM limit: tile working set + headroom, never at physical cap ----
    tile_bytes = _tile_bytes(tm_eff, tn_eff)
    vmem_limit = max(32 << 20, tile_bytes + (8 << 20))
    vmem_limit = int(min(vmem_limit, vmem_cap - (8 << 20)))

    # ---- cost estimate (kept in sync with the chosen loop order) -----------
    x_passes = grid_n if n_outer else 1
    w_passes = 1 if n_outer else grid_m
    cost = pl.CostEstimate(
        flops=2 * M * D * V,
        transcendentals=0,
        bytes_accessed=(x_passes * M * D * x_size
                        + w_passes * D * V * w_size
                        + V * b_size
                        + M * V * out_size),
    )

    kernel = functools.partial(_proj_kernel, compute_dtype=compute_dtype)

    out = pl.pallas_call(
        kernel,
        out_shape=jax.ShapeDtypeStruct((M, V), out_dtype),
        grid_spec=pltpu.PrefetchScalarGridSpec(
            num_scalar_prefetch=0,
            grid=grid,
            in_specs=[x_spec, w_spec, b_spec],
            out_specs=o_spec,
        ),
        compiler_params=pltpu.CompilerParams(
            dimension_semantics=("parallel", "parallel"),
            vmem_limit_bytes=vmem_limit,
        ),
        cost_estimate=cost,
    )(x2, w, b2)

    return out.reshape(B, T, V)


def init_projection_params(key, d_model, vocab_size, dtype=jnp.float32):
    """Deterministic init matching nn.Linear default (uniform +/- 1/sqrt(fan_in))."""
    kw, kb = jax.random.split(key)
    bound = 1.0 / math.sqrt(d_model)
    # PyTorch stores weight as [vocab, d_model]; we keep the transposed [d_model, vocab].
    w = jax.random.uniform(kw, (d_model, vocab_size), dtype, -bound, bound)
    b = jax.random.uniform(kb, (vocab_size,), dtype, -bound, bound)
    return w, b


if __name__ == "__main__":
    key = jax.random.PRNGKey(0)

    # --- Problem A: small, ragged M and V (exercises n-outer order + masked
    # remainder tiles when forced into a multi-block grid). ---
    batch, seq, d_model, vocab_size = 2, 9, 32, 320
    kx, kp, kx2, kp2 = jax.random.split(key, 4)
    x = jax.random.normal(kx, (batch, seq, d_model), jnp.float32)
    w, b = init_projection_params(kp, d_model, vocab_size)
    ref = x @ w + b

    # 1) Default path (single-block grid), f32 compute.
    out = jax.block_until_ready(projection_layer(x, w, b))
    assert out.shape == (batch, seq, vocab_size)
    assert jnp.allclose(out, ref, atol=1e-5, rtol=1e-5)

    # 2) Force a multi-block grid (masked remainder stores on both M and V,
    #    n-outer loop order since the weight is the larger operand).
    out_tiled = jax.block_until_ready(projection_layer(x, w, b, tm=8, tn=128))
    assert jnp.allclose(out_tiled, ref, atol=1e-5, rtol=1e-5)

    # 3) Persistent-bf16 weight + bf16 MXU compute (f32 accumulation, f32 out).
    w_bf16 = w.astype(jnp.bfloat16)
    b_bf16 = b.astype(jnp.bfloat16)
    out_bf16 = jax.block_until_ready(
        projection_layer(x, w_bf16, b_bf16, compute_dtype=jnp.bfloat16))
    assert jnp.allclose(out_bf16, ref, atol=5e-2, rtol=5e-2)

    # --- Problem B: many tokens, small vocab -> m-outer loop order (x read
    # once, W re-streamed), with a ragged V tile. ---
    batch2, seq2, d_model2, vocab2 = 4, 128, 32, 520
    x_b = jax.random.normal(kx2, (batch2, seq2, d_model2), jnp.float32)
    w_b, b_b = init_projection_params(kp2, d_model2, vocab2)
    ref_b = x_b @ w_b + b_b
    out_b = jax.block_until_ready(projection_layer(x_b, w_b, b_b, tm=256, tn=128))
    assert jnp.allclose(out_b, ref_b, atol=1e-5, rtol=1e-5)

    print("KERNEL_OK")
</pallas_src>

<mosaic_0001>
module attributes {stable_mosaic.version = 11 : i64} {
  func.func @_proj_kernel(%arg0: i32, %arg1: i32, %arg2: memref<24x32xf32, #tpu.memory_space<vmem>>, %arg3: memref<32x384xf32, #tpu.memory_space<vmem>>, %arg4: memref<1x384xf32, #tpu.memory_space<vmem>>, %arg5: memref<24x384xf32, #tpu.memory_space<vmem>>) attributes {dimension_semantics = [#tpu.dimension_semantics<parallel>, #tpu.dimension_semantics<parallel>], iteration_bounds = array<i64: 1, 1>, scalar_prefetch = 0 : i64, scratch_operands = 0 : i64, tpu.core_type = #tpu.core_type<tc>, window_params = [{transform_indices = @transform_0, window_bounds = array<i64: 24, 32>}, {transform_indices = @transform_1, window_bounds = array<i64: 32, 384>}, {transform_indices = @transform_2, window_bounds = array<i64: 1, 384>}, {transform_indices = @transform_3, window_bounds = array<i64: 24, 384>}]} {
    %c0 = arith.constant 0 : index
    %c0_0 = arith.constant 0 : index
    %0 = vector.load %arg2[%c0, %c0_0] : memref<24x32xf32, #tpu.memory_space<vmem>>, vector<24x32xf32>
    %c0_1 = arith.constant 0 : index
    %c0_2 = arith.constant 0 : index
    %1 = vector.load %arg3[%c0_1, %c0_2] : memref<32x384xf32, #tpu.memory_space<vmem>>, vector<32x384xf32>
    %cst = arith.constant dense<0.000000e+00> : vector<24x384xf32>
    %2 = tpu.matmul %0, %1, %cst {dimension_numbers = #tpu.dot_dimension_numbers<[1], [0], [0], [1], [0, 0, 1, 1], [], []>} : vector<24x32xf32>, vector<32x384xf32>, vector<24x384xf32> -> vector<24x384xf32>
    %c0_3 = arith.constant 0 : index
    %c0_4 = arith.constant 0 : index
    %3 = vector.load %arg4[%c0_3, %c0_4] : memref<1x384xf32, #tpu.memory_space<vmem>>, vector<1x384xf32>
    %4 = vector.broadcast %3 : vector<1x384xf32> to vector<24x384xf32>
    %5 = arith.addf %2, %4 : vector<24x384xf32>
    %c0_5 = arith.constant 0 : index
    %c0_6 = arith.constant 0 : index
    %6 = vector.load %arg5[%c0_5, %c0_6] : memref<24x384xf32, #tpu.memory_space<vmem>>, vector<24x384xf32>
    tpu.vector_store %arg5[%c0_5, %c0_6], %5 {strides = array<i32>} : memref<24x384xf32, #tpu.memory_space<vmem>>, vector<24x384xf32>,
    return
  }
  func.func @transform_0(%arg0: i32, %arg1: i32) -> (i32, i32) {
    %c0_i32 = arith.constant 0 : i32
    %c0_i32_0 = arith.constant 0 : i32
    return %arg0, %c0_i32 : i32, i32
  }
  func.func @transform_1(%arg0: i32, %arg1: i32) -> (i32, i32) {
    %c0_i32 = arith.constant 0 : i32
    %c0_i32_0 = arith.constant 0 : i32
    return %c0_i32, %arg1 : i32, i32
  }
  func.func @transform_2(%arg0: i32, %arg1: i32) -> (i32, i32) {
    %c0_i32 = arith.constant 0 : i32
    %c0_i32_0 = arith.constant 0 : i32
    return %c0_i32, %arg1 : i32, i32
  }
  func.func @transform_3(%arg0: i32, %arg1: i32) -> (i32, i32) {
    %c0_i32 = arith.constant 0 : i32
    return %arg0, %arg1 : i32, i32
  }
}

</mosaic_0001>

<bundles_post_ra>
// kernel: projection_layer.1
= control target key start
LH: loop header
LB: loop body
LE: loop exit
PB: predicated region body
PF: predicated region fallthrough
CT: control target
= control target key end

     0   :  { %v279_v2 = vmov 0.0|0.0   ;;  %v280_v4 = vmov 0.0   ;;  %vm281_vm0 = vmmov 0   ;;  %vm46_vm1 = vcmask 261120   ;;  %s380_s1 = inlined_call_operand.vmem [shape: f32[32,320], index: 1, kind: input, shape index: {}]   ;;  %s381_s0 = inlined_call_operand.vmem [shape: f32[18,32], index: 0, kind: input, shape index: {}]   ;;  %s382_s2 = inlined_call_operand.vmem [shape: f32[1,320], index: 2, kind: input, shape index: {}]   ;;  %s383_s3 = inlined_call_operand.vmem [shape: f32[18,320], index: 3, kind: output, shape index: {}]  }
   0x1   :  { %v18_v0 = vld [vmem:[%s380_s1 + $0x8] sm:$0xff]  ;;  %v21_v1 = vld [vmem:[%s380_s1 + $0x20] sm:$0xff]  ;;  %270 = vmatprep.subr.bf16.mxu1 %v279_v2  ;;  %120 = vmatprep.mubr.f32.mxu0 %v280_v4  ;;  %v20_v6 = vld [vmem:[%s380_s1 + $0x18] sm:$0xff]  ;;  %v31_v23 = vlaneseq }
   0x2   :  { %v17_v3 = vld [vmem:[%s380_s1] sm:$0xff]  ;;  %v262_v5 = vpack.c.bf16 %v21_v1, %v18_v0  ;;  %v19_v7 = vld [vmem:[%s380_s1 + $0x10] sm:$0xff]  ;;  %v22_v8 = vld [vmem:[%s380_s1 + $0x28] sm:$0xff]  ;;  %253 = vmatprep.mubr.msk.f32.mxu1 %vm281_vm0, %v280_v4 }
   0x3   :  { %v264_v9 = vpack.c.bf16 %v20_v6, %v17_v3  ;;  %v271_v10 = vpack.c.bf16 %v22_v8, %v19_v7  ;;  %v24_v11 = vld [vmem:[%s380_s1 + $0x38] sm:$0xff]  ;;  %v27_v12 = vld [vmem:[%s380_s1 + $0x50] sm:$0xff]  ;;  %v26_v15 = vld [vmem:[%s380_s1 + $0x48] sm:$0xff]  ;;  %v32_v24 = vshrl.u32 %v31_v23, 7 }
   0x4   :  { %v23_v13 = vld [vmem:[%s380_s1 + $0x30] sm:$0xff]  ;;  %263 = vmatprep.subr.bf16.mxu0 %v262_v5  ;;  %v266_v14 = vpack.c.bf16 %v27_v12, %v24_v11  ;;  %v25_v16 = vld [vmem:[%s380_s1 + $0x40] sm:$0xff]  ;;  %v28_v17 = vld [vmem:[%s380_s1 + $0x58] sm:$0xff] }
   0x5   :  { %265 = vmatpush1.bf16.msra.mxu0 %v264_v9  ;;  %272 = vmatpush3.bf16.msra.mxu1 %v271_v10  ;;  %v268_v18 = vpack.c.bf16 %v26_v15, %v23_v13  ;;  %v274_v19 = vpack.c.bf16 %v28_v17, %v25_v16  ;;  %v14_v20 = vld [vmem:[%s381_s0] sm:$0xff]  ;;  %v15_v21 = vld [vmem:[%s381_s0 + $0x8] sm:$0xff]  ;;  %v16_v22 = vld [vmem:[%s381_s0 + $0x10] sm:$0xff]  ;;  %v33_v25 = vsub.s32 0, %v32_v24  ;;  %v41_v26 = vsub.s32 2, %v32_v24 }
   0x6   :  { %267 = vmatprep.subr.bf16.mxu0 %v266_v14  ;;  %273 = vmatprep.subr.bf16.mxu1 %v279_v2  ;;  %v29_v27 = vld [vmem:[%s382_s2] sm:$0x7]  ;;  %v37_v28 = vsub.s32 1, %v32_v24 }
   0x7   :  { %v34_v29 = vrot.slane %v29_v27, %v33_v25  ;;  %v42_v30 = vrot.slane %v29_v27, %v41_v26 }
   0x8   :  { %v38_v31 = vrot.slane %v29_v27, %v37_v28 }
   0x9   :  { %269 = vmatpush1.bf16.msra.mxu0 %v268_v18  ;;  %275 = vmatpush3.bf16.msra.mxu1 %v274_v19 }
   0xc   :  { %232 = vmatmul.mubr.msk.f32.vlgmr.msra.gmra.mrb[0].mxu0 %vm46_vm1, %v14_v20  ;;  %254 = vmatmul.mubr.msk.f32.vlgmr.msra.gmra.mrb[0].mxu1 %vm46_vm1, %v14_v20 }
   0xd   :  { %126 = vmatprep.mubr.f32.mxu0 %v280_v4  ;;  %256 = vmatprep.mubr.msk.f32.mxu1 %vm281_vm0, %v280_v4 }
  0x10   :  { %233 = vmatmul.mubr.msk.f32.gmra.mrb[2].mxu0 %vm46_vm1, %v15_v21  ;;  %257 = vmatmul.mubr.msk.f32.gmra.mrb[2].mxu1 %vm46_vm1, %v15_v21 }
  0x11   :  { %132 = vmatprep.mubr.f32.mxu0 %v280_v4  ;;  %259 = vmatprep.mubr.msk.f32.mxu1 %vm281_vm0, %v280_v4 }
  0x14   :  { %234 = vmatmul.mubr.msk.f32.gmra.mrb[4].mxu0 %vm46_vm1, %v16_v22  ;;  %260 = vmatmul.mubr.msk.f32.gmra.mrb[4].mxu1 %vm46_vm1, %v16_v22 }
  0xdf   :  { %v122_v32 = vpop.f32.mrb[0].mxu0  ;;  %v205_v33 = vpop.f32.mrb[0].mxu1 }
  0xe0   :  { %v123_v34 = vadd.f32 %v122_v32, %v34_v29  ;;  %v206_v35 = vadd.f32 %v205_v33, %v42_v30  ;;  %v124_v36 = vpop.f32.mrb[1].mxu0  ;;  %v255_v37 = vpop.f32.mrb[1].mxu1 }
  0xe1   :  { %v125_v38 = vadd.f32 %v124_v36, %v38_v31 }
  0xe2   :  { %219 = vst [vmem:[%s383_s3] sm:$0xff] %v123_v34  ;;  %221 = vst [vmem:[%s383_s3 + $0x10] sm:$0xff] %v206_v35 }
  0xe3   :  { %220 = vst [vmem:[%s383_s3 + $0x8] sm:$0xff] %v125_v38  ;;  %v128_v39 = vpop.f32.mrb[2].mxu0  ;;  %v210_v40 = vpop.f32.mrb[2].mxu1 }
  0xe4   :  { %v129_v41 = vadd.f32 %v128_v39, %v34_v29  ;;  %v211_v42 = vadd.f32 %v210_v40, %v42_v30  ;;  %v130_v43 = vpop.f32.mrb[3].mxu0  ;;  %v258_v44 = vpop.f32.mrb[3].mxu1 }
  0xe5   :  { %v131_v45 = vadd.f32 %v130_v43, %v38_v31 }
  0xe6   :  { %222 = vst [vmem:[%s383_s3 + $0x18] sm:$0xff] %v129_v41  ;;  %224 = vst [vmem:[%s383_s3 + $0x28] sm:$0xff] %v211_v42 }
  0xe7   :  { %223 = vst [vmem:[%s383_s3 + $0x20] sm:$0xff] %v131_v45  ;;  %v134_v46 = vpop.f32.mrb[4].mxu0  ;;  %v215_v47 = vpop.f32.mrb[4].mxu1 }
  0xe8   :  { %v135_v48 = vadd.f32 %v134_v46, %v34_v29  ;;  %v216_v49 = vadd.f32 %v215_v47, %v42_v30  ;;  %v136_v50 = vpop.f32.mrb[5].mxu0  ;;  %v261_v51 = vpop.f32.mrb[5].mxu1 }
  0xe9   :  { %v137_v52 = vadd.f32 %v136_v50, %v38_v31 }
  0xea   :  { %225 = vst [vmem:[%s383_s3 + $0x30] sm:$0xff] %v135_v48  ;;  %227 = vst [vmem:[%s383_s3 + $0x40] sm:$0xff] %v216_v49 }
  0xeb   :  { %226 = vst [vmem:[%s383_s3 + $0x38] sm:$0xff] %v137_v52 }

</bundles_post_ra>
